<compile_context>
chip_gen: v7x
topology: tpu7x:2x2x1
jax: 0.10.0
libtpu: 0.0.40
codegen_flags: <defaults>
</compile_context>

<pallas_src>
import functools
import math

import jax
import jax.numpy as jnp
from jax import lax
from jax.experimental import pallas as pl
from jax.experimental.pallas import tpu as pltpu


# ------------------------------ Fused kernel ------------------------------- #

def _fused_mha_kernel(q_ref, k_ref, v_ref,
                      wq_ref, bq_ref, wk_ref, bk_ref, wv_ref, bv_ref,
                      wo_ref, bo_ref,
                      o_ref,
                      *, num_heads, d_head, scale, mxu_dtype):
    """One grid point = one batch element. Activation blocks are (1, S, D)."""
    # Contract the last dim of x with the last dim of W ([out, in] layout):
    # y = x @ W^T without materializing a transpose anywhere.
    dn_t = (((1,), (1,)), ((), ()))

    def linear(x, w_ref, b_ref):
        y = lax.dot_general(x.astype(mxu_dtype), w_ref[...].astype(mxu_dtype),
                            dn_t, preferred_element_type=jnp.float32)
        return y + b_ref[...]                      # bias is (1, out) -> broadcasts

    xq = q_ref[0]                                  # (S, d_model)
    xk = k_ref[0]
    xv = v_ref[0]

    # Projections (S, H*d_head); fold 1/sqrt(d_head) into Q (cheaper than S x S).
    q = linear(xq, wq_ref, bq_ref) * scale
    k = linear(xk, wk_ref, bk_ref)
    v = linear(xv, wv_ref, bv_ref)

    wo = wo_ref[...]                               # (d_model, H*d_head)
    seq_len = xq.shape[0]
    d_model = wo.shape[0]

    # Per-head attention; fuse head-concat + output projection as a sum of
    # per-head matmuls: out = sum_h o_h @ Wo[:, h*Dh:(h+1)*Dh]^T  (+ bias).
    acc = jnp.zeros((seq_len, d_model), jnp.float32)
    for h in range(num_heads):                     # static unroll, H is small
        sl = slice(h * d_head, (h + 1) * d_head)
        qh = q[:, sl]                              # (S, Dh)
        kh = k[:, sl]
        vh = v[:, sl]

        # scores: contract last dims (no explicit K transpose)
        s = lax.dot_general(qh.astype(mxu_dtype), kh.astype(mxu_dtype),
                            dn_t, preferred_element_type=jnp.float32)   # (S, S)
        s_max = jnp.max(s, axis=-1, keepdims=True)
        p = jnp.exp(s - s_max)
        p = p * pl.reciprocal(jnp.sum(p, axis=-1, keepdims=True), approx=True)

        oh = jnp.dot(p.astype(mxu_dtype), vh.astype(mxu_dtype),
                     preferred_element_type=jnp.float32)                # (S, Dh)

        acc = acc + lax.dot_general(oh.astype(mxu_dtype),
                                    wo[:, sl].astype(mxu_dtype),
                                    dn_t, preferred_element_type=jnp.float32)

    o_ref[0] = (acc + bo_ref[...]).astype(o_ref.dtype)


# ------------------------------- Forward pass ------------------------------ #

def mha_forward(params, query, key, value, *, num_heads,
                mxu_dtype=jnp.float32):
    """query/key/value: [B, S, d_model] -> output: [B, S, d_model].

    `mxu_dtype=jnp.bfloat16` can be used on v6e/v7x for larger shapes (f32
    accumulation is kept either way); default f32 matches the torch module.
    """
    B, S, d_model = query.shape
    proj_dim = params["wq"].shape[0]               # d_model * num_heads // 2
    d_head = proj_dim // num_heads                 # == d_model // 2
    scale = 1.0 / math.sqrt(d_head)

    kern = functools.partial(_fused_mha_kernel,
                             num_heads=num_heads, d_head=d_head,
                             scale=scale, mxu_dtype=mxu_dtype)

    act_spec = pl.BlockSpec((1, S, d_model), lambda b: (b, 0, 0))

    def full(shape):
        return pl.BlockSpec(shape, lambda b: (0,) * len(shape))

    return pl.pallas_call(
        kern,
        out_shape=jax.ShapeDtypeStruct((B, S, d_model), query.dtype),
        grid=(B,),
        in_specs=[
            act_spec, act_spec, act_spec,
            full((proj_dim, d_model)), full((1, proj_dim)),   # wq, bq
            full((proj_dim, d_model)), full((1, proj_dim)),   # wk, bk
            full((proj_dim, d_model)), full((1, proj_dim)),   # wv, bv
            full((d_model, proj_dim)), full((1, d_model)),    # wo, bo
        ],
        out_specs=act_spec,
        compiler_params=pltpu.CompilerParams(
            dimension_semantics=("parallel",)),
    )(query, key, value,
      params["wq"], params["bq"],
      params["wk"], params["bk"],
      params["wv"], params["bv"],
      params["wo"], params["bo"])


# ------------------------------ Parameter setup ---------------------------- #

def init_params(key, d_model, num_heads, dtype=jnp.float32):
    proj_dim = d_model * num_heads // 2
    ks = jax.random.split(key, 8)
    sc = 0.05

    def w(k, shape):
        return jax.random.normal(k, shape, dtype) * sc

    # Weights kept in nn.Linear [out_features, in_features] layout (never
    # transposed on the host); biases stored as (1, out) so they DMA as a
    # 2-D VMEM tile and broadcast directly inside the kernel.
    return {
        "wq": w(ks[0], (proj_dim, d_model)), "bq": w(ks[1], (1, proj_dim)),
        "wk": w(ks[2], (proj_dim, d_model)), "bk": w(ks[3], (1, proj_dim)),
        "wv": w(ks[4], (proj_dim, d_model)), "bv": w(ks[5], (1, proj_dim)),
        "wo": w(ks[6], (d_model, proj_dim)), "bo": w(ks[7], (1, d_model)),
    }


# --------------------------- Pure-JAX reference ----------------------------- #

def mha_reference(params, query, key, value, *, num_heads):
    proj_dim = params["wq"].shape[0]
    d_head = proj_dim // num_heads
    scale = 1.0 / math.sqrt(d_head)
    B, S, _ = query.shape

    def lin(x, w, b):
        return jnp.einsum("bsd,od->bso", x, w) + b[0]

    q = lin(query, params["wq"], params["bq"])
    k = lin(key, params["wk"], params["bk"])
    v = lin(value, params["wv"], params["bv"])

    q = q.reshape(B, S, num_heads, d_head).transpose(0, 2, 1, 3)
    k = k.reshape(B, S, num_heads, d_head).transpose(0, 2, 1, 3)
    v = v.reshape(B, S, num_heads, d_head).transpose(0, 2, 1, 3)

    s = jnp.einsum("bhqd,bhkd->bhqk", q, k) * scale
    p = jax.nn.softmax(s, axis=-1)
    o = jnp.einsum("bhqk,bhkd->bhqd", p, v)
    o = o.transpose(0, 2, 1, 3).reshape(B, S, num_heads * d_head)
    return jnp.einsum("bso,do->bsd", o, params["wo"]) + params["bo"][0]


# ----------------------------------- Main ----------------------------------- #

if __name__ == "__main__":
    B, S, d_model, num_heads = 2, 8, 32, 4

    root = jax.random.PRNGKey(0)
    kp, kq, kk, kv = jax.random.split(root, 4)

    params = init_params(kp, d_model, num_heads)
    query = jax.random.normal(kq, (B, S, d_model), jnp.float32)
    key_in = jax.random.normal(kk, (B, S, d_model), jnp.float32)
    value = jax.random.normal(kv, (B, S, d_model), jnp.float32)

    out = mha_forward(params, query, key_in, value, num_heads=num_heads)
    out = jax.block_until_ready(out)

    assert out.shape == (B, S, d_model), out.shape
    assert jnp.isfinite(out).all()

    # Tolerance check against a pure-JAX reference (loose tol: approx reciprocal).
    ref = mha_reference(params, query, key_in, value, num_heads=num_heads)
    assert jnp.allclose(out, ref, rtol=1e-2, atol=1e-2), (
        float(jnp.max(jnp.abs(out - ref))))

    print("KERNEL_OK")
</pallas_src>

<mosaic_0001>
module attributes {stable_mosaic.version = 11 : i64} {
  func.func @_fused_mha_kernel(%arg0: i32, %arg1: memref<1x8x32xf32, #tpu.memory_space<vmem>>, %arg2: memref<1x8x32xf32, #tpu.memory_space<vmem>>, %arg3: memref<1x8x32xf32, #tpu.memory_space<vmem>>, %arg4: memref<64x32xf32, #tpu.memory_space<vmem>>, %arg5: memref<1x64xf32, #tpu.memory_space<vmem>>, %arg6: memref<64x32xf32, #tpu.memory_space<vmem>>, %arg7: memref<1x64xf32, #tpu.memory_space<vmem>>, %arg8: memref<64x32xf32, #tpu.memory_space<vmem>>, %arg9: memref<1x64xf32, #tpu.memory_space<vmem>>, %arg10: memref<32x64xf32, #tpu.memory_space<vmem>>, %arg11: memref<1x32xf32, #tpu.memory_space<vmem>>, %arg12: memref<1x8x32xf32, #tpu.memory_space<vmem>>) attributes {dimension_semantics = [#tpu.dimension_semantics<parallel>], iteration_bounds = array<i64: 2>, scalar_prefetch = 0 : i64, scratch_operands = 0 : i64, tpu.core_type = #tpu.core_type<tc>, window_params = [{transform_indices = @transform_0, window_bounds = array<i64: 1, 8, 32>}, {transform_indices = @transform_1, window_bounds = array<i64: 1, 8, 32>}, {transform_indices = @transform_2, window_bounds = array<i64: 1, 8, 32>}, {pipeline_mode = #tpu.pipeline_mode<synchronous>, transform_indices = @transform_3, window_bounds = array<i64: 64, 32>}, {pipeline_mode = #tpu.pipeline_mode<synchronous>, transform_indices = @transform_4, window_bounds = array<i64: 1, 64>}, {pipeline_mode = #tpu.pipeline_mode<synchronous>, transform_indices = @transform_5, window_bounds = array<i64: 64, 32>}, {pipeline_mode = #tpu.pipeline_mode<synchronous>, transform_indices = @transform_6, window_bounds = array<i64: 1, 64>}, {pipeline_mode = #tpu.pipeline_mode<synchronous>, transform_indices = @transform_7, window_bounds = array<i64: 64, 32>}, {pipeline_mode = #tpu.pipeline_mode<synchronous>, transform_indices = @transform_8, window_bounds = array<i64: 1, 64>}, {pipeline_mode = #tpu.pipeline_mode<synchronous>, transform_indices = @transform_9, window_bounds = array<i64: 32, 64>}, {pipeline_mode = #tpu.pipeline_mode<synchronous>, transform_indices = @transform_10, window_bounds = array<i64: 1, 32>}, {transform_indices = @transform_11, window_bounds = array<i64: 1, 8, 32>}]} {
    %c0 = arith.constant 0 : index
    %c0_0 = arith.constant 0 : index
    %c0_1 = arith.constant 0 : index
    %0 = vector.load %arg1[%c0, %c0_0, %c0_1] : memref<1x8x32xf32, #tpu.memory_space<vmem>>, vector<1x8x32xf32>
    %1 = vector.shape_cast %0 : vector<1x8x32xf32> to vector<8x32xf32>
    %c0_2 = arith.constant 0 : index
    %c0_3 = arith.constant 0 : index
    %c0_4 = arith.constant 0 : index
    %2 = vector.load %arg2[%c0_2, %c0_3, %c0_4] : memref<1x8x32xf32, #tpu.memory_space<vmem>>, vector<1x8x32xf32>
    %3 = vector.shape_cast %2 : vector<1x8x32xf32> to vector<8x32xf32>
    %c0_5 = arith.constant 0 : index
    %c0_6 = arith.constant 0 : index
    %c0_7 = arith.constant 0 : index
    %4 = vector.load %arg3[%c0_5, %c0_6, %c0_7] : memref<1x8x32xf32, #tpu.memory_space<vmem>>, vector<1x8x32xf32>
    %5 = vector.shape_cast %4 : vector<1x8x32xf32> to vector<8x32xf32>
    %c0_8 = arith.constant 0 : index
    %c0_9 = arith.constant 0 : index
    %6 = vector.load %arg4[%c0_8, %c0_9] : memref<64x32xf32, #tpu.memory_space<vmem>>, vector<64x32xf32>
    %cst = arith.constant dense<0.000000e+00> : vector<8x64xf32>
    %7 = tpu.matmul %1, %6, %cst {dimension_numbers = #tpu.dot_dimension_numbers<[1], [1], [0], [0], [0, 0, 1, 0], [], []>} : vector<8x32xf32>, vector<64x32xf32>, vector<8x64xf32> -> vector<8x64xf32>
    %c0_10 = arith.constant 0 : index
    %c0_11 = arith.constant 0 : index
    %8 = vector.load %arg5[%c0_10, %c0_11] : memref<1x64xf32, #tpu.memory_space<vmem>>, vector<1x64xf32>
    %9 = vector.broadcast %8 : vector<1x64xf32> to vector<8x64xf32>
    %10 = arith.addf %7, %9 : vector<8x64xf32>
    %cst_12 = arith.constant 2.500000e-01 : f32
    %11 = vector.broadcast %cst_12 : f32 to vector<8x64xf32>
    %12 = arith.mulf %10, %11 : vector<8x64xf32>
    %c0_13 = arith.constant 0 : index
    %c0_14 = arith.constant 0 : index
    %13 = vector.load %arg6[%c0_13, %c0_14] : memref<64x32xf32, #tpu.memory_space<vmem>>, vector<64x32xf32>
    %cst_15 = arith.constant dense<0.000000e+00> : vector<8x64xf32>
    %14 = tpu.matmul %3, %13, %cst_15 {dimension_numbers = #tpu.dot_dimension_numbers<[1], [1], [0], [0], [0, 0, 1, 0], [], []>} : vector<8x32xf32>, vector<64x32xf32>, vector<8x64xf32> -> vector<8x64xf32>
    %c0_16 = arith.constant 0 : index
    %c0_17 = arith.constant 0 : index
    %15 = vector.load %arg7[%c0_16, %c0_17] : memref<1x64xf32, #tpu.memory_space<vmem>>, vector<1x64xf32>
    %16 = vector.broadcast %15 : vector<1x64xf32> to vector<8x64xf32>
    %17 = arith.addf %14, %16 : vector<8x64xf32>
    %c0_18 = arith.constant 0 : index
    %c0_19 = arith.constant 0 : index
    %18 = vector.load %arg8[%c0_18, %c0_19] : memref<64x32xf32, #tpu.memory_space<vmem>>, vector<64x32xf32>
    %cst_20 = arith.constant dense<0.000000e+00> : vector<8x64xf32>
    %19 = tpu.matmul %5, %18, %cst_20 {dimension_numbers = #tpu.dot_dimension_numbers<[1], [1], [0], [0], [0, 0, 1, 0], [], []>} : vector<8x32xf32>, vector<64x32xf32>, vector<8x64xf32> -> vector<8x64xf32>
    %c0_21 = arith.constant 0 : index
    %c0_22 = arith.constant 0 : index
    %20 = vector.load %arg9[%c0_21, %c0_22] : memref<1x64xf32, #tpu.memory_space<vmem>>, vector<1x64xf32>
    %21 = vector.broadcast %20 : vector<1x64xf32> to vector<8x64xf32>
    %22 = arith.addf %19, %21 : vector<8x64xf32>
    %c0_23 = arith.constant 0 : index
    %c0_24 = arith.constant 0 : index
    %23 = vector.load %arg10[%c0_23, %c0_24] : memref<32x64xf32, #tpu.memory_space<vmem>>, vector<32x64xf32>
    %cst_25 = arith.constant 0.000000e+00 : f32
    %24 = vector.broadcast %cst_25 : f32 to vector<8x32xf32>
    %25 = vector.extract_strided_slice %12 {offsets = [0, 0], sizes = [8, 16], strides = [1, 1]} : vector<8x64xf32> to vector<8x16xf32>
    %26 = vector.extract_strided_slice %17 {offsets = [0, 0], sizes = [8, 16], strides = [1, 1]} : vector<8x64xf32> to vector<8x16xf32>
    %27 = vector.extract_strided_slice %22 {offsets = [0, 0], sizes = [8, 16], strides = [1, 1]} : vector<8x64xf32> to vector<8x16xf32>
    %cst_26 = arith.constant dense<0.000000e+00> : vector<8x8xf32>
    %28 = tpu.matmul %25, %26, %cst_26 {dimension_numbers = #tpu.dot_dimension_numbers<[1], [1], [0], [0], [0, 0, 1, 0], [], []>} : vector<8x16xf32>, vector<8x16xf32>, vector<8x8xf32> -> vector<8x8xf32>
    %cst_27 = arith.constant dense<0xFF800000> : vector<8xf32>
    %29 = vector.multi_reduction <maximumf>, %28, %cst_27 [1] : vector<8x8xf32> to vector<8xf32>
    %30 = vector.shape_cast %29 : vector<8xf32> to vector<8x1xf32>
    %31 = vector.broadcast %30 : vector<8x1xf32> to vector<8x8xf32>
    %32 = arith.subf %28, %31 : vector<8x8xf32>
    %33 = math.exp %32 : vector<8x8xf32>
    %cst_28 = arith.constant dense<0.000000e+00> : vector<8xf32>
    %34 = vector.multi_reduction <add>, %33, %cst_28 [1] : vector<8x8xf32> to vector<8xf32>
    %35 = vector.shape_cast %34 : vector<8xf32> to vector<8x1xf32>
    %36 = tpu.reciprocal %35 {approx = true} : vector<8x1xf32> -> vector<8x1xf32>
    %37 = vector.broadcast %36 : vector<8x1xf32> to vector<8x8xf32>
    %38 = arith.mulf %33, %37 : vector<8x8xf32>
    %cst_29 = arith.constant dense<0.000000e+00> : vector<8x16xf32>
    %39 = tpu.matmul %38, %27, %cst_29 {dimension_numbers = #tpu.dot_dimension_numbers<[1], [0], [0], [1], [0, 0, 1, 1], [], []>} : vector<8x8xf32>, vector<8x16xf32>, vector<8x16xf32> -> vector<8x16xf32>
    %40 = vector.extract_strided_slice %23 {offsets = [0, 0], sizes = [32, 16], strides = [1, 1]} : vector<32x64xf32> to vector<32x16xf32>
    %cst_30 = arith.constant dense<0.000000e+00> : vector<8x32xf32>
    %41 = tpu.matmul %39, %40, %cst_30 {dimension_numbers = #tpu.dot_dimension_numbers<[1], [1], [0], [0], [0, 0, 1, 0], [], []>} : vector<8x16xf32>, vector<32x16xf32>, vector<8x32xf32> -> vector<8x32xf32>
    %42 = arith.addf %24, %41 : vector<8x32xf32>
    %43 = vector.extract_strided_slice %12 {offsets = [0, 16], sizes = [8, 16], strides = [1, 1]} : vector<8x64xf32> to vector<8x16xf32>
    %44 = vector.extract_strided_slice %17 {offsets = [0, 16], sizes = [8, 16], strides = [1, 1]} : vector<8x64xf32> to vector<8x16xf32>
    %45 = vector.extract_strided_slice %22 {offsets = [0, 16], sizes = [8, 16], strides = [1, 1]} : vector<8x64xf32> to vector<8x16xf32>
    %cst_31 = arith.constant dense<0.000000e+00> : vector<8x8xf32>
    %46 = tpu.matmul %43, %44, %cst_31 {dimension_numbers = #tpu.dot_dimension_numbers<[1], [1], [0], [0], [0, 0, 1, 0], [], []>} : vector<8x16xf32>, vector<8x16xf32>, vector<8x8xf32> -> vector<8x8xf32>
    %cst_32 = arith.constant dense<0xFF800000> : vector<8xf32>
    %47 = vector.multi_reduction <maximumf>, %46, %cst_32 [1] : vector<8x8xf32> to vector<8xf32>
    %48 = vector.shape_cast %47 : vector<8xf32> to vector<8x1xf32>
    %49 = vector.broadcast %48 : vector<8x1xf32> to vector<8x8xf32>
    %50 = arith.subf %46, %49 : vector<8x8xf32>
    %51 = math.exp %50 : vector<8x8xf32>
    %cst_33 = arith.constant dense<0.000000e+00> : vector<8xf32>
    %52 = vector.multi_reduction <add>, %51, %cst_33 [1] : vector<8x8xf32> to vector<8xf32>
    %53 = vector.shape_cast %52 : vector<8xf32> to vector<8x1xf32>
    %54 = tpu.reciprocal %53 {approx = true} : vector<8x1xf32> -> vector<8x1xf32>
    %55 = vector.broadcast %54 : vector<8x1xf32> to vector<8x8xf32>
    %56 = arith.mulf %51, %55 : vector<8x8xf32>
    %cst_34 = arith.constant dense<0.000000e+00> : vector<8x16xf32>
    %57 = tpu.matmul %56, %45, %cst_34 {dimension_numbers = #tpu.dot_dimension_numbers<[1], [0], [0], [1], [0, 0, 1, 1], [], []>} : vector<8x8xf32>, vector<8x16xf32>, vector<8x16xf32> -> vector<8x16xf32>
    %58 = vector.extract_strided_slice %23 {offsets = [0, 16], sizes = [32, 16], strides = [1, 1]} : vector<32x64xf32> to vector<32x16xf32>
    %cst_35 = arith.constant dense<0.000000e+00> : vector<8x32xf32>
    %59 = tpu.matmul %57, %58, %cst_35 {dimension_numbers = #tpu.dot_dimension_numbers<[1], [1], [0], [0], [0, 0, 1, 0], [], []>} : vector<8x16xf32>, vector<32x16xf32>, vector<8x32xf32> -> vector<8x32xf32>
    %60 = arith.addf %42, %59 : vector<8x32xf32>
    %61 = vector.extract_strided_slice %12 {offsets = [0, 32], sizes = [8, 16], strides = [1, 1]} : vector<8x64xf32> to vector<8x16xf32>
    %62 = vector.extract_strided_slice %17 {offsets = [0, 32], sizes = [8, 16], strides = [1, 1]} : vector<8x64xf32> to vector<8x16xf32>
    %63 = vector.extract_strided_slice %22 {offsets = [0, 32], sizes = [8, 16], strides = [1, 1]} : vector<8x64xf32> to vector<8x16xf32>
    %cst_36 = arith.constant dense<0.000000e+00> : vector<8x8xf32>
    %64 = tpu.matmul %61, %62, %cst_36 {dimension_numbers = #tpu.dot_dimension_numbers<[1], [1], [0], [0], [0, 0, 1, 0], [], []>} : vector<8x16xf32>, vector<8x16xf32>, vector<8x8xf32> -> vector<8x8xf32>
    %cst_37 = arith.constant dense<0xFF800000> : vector<8xf32>
    %65 = vector.multi_reduction <maximumf>, %64, %cst_37 [1] : vector<8x8xf32> to vector<8xf32>
    %66 = vector.shape_cast %65 : vector<8xf32> to vector<8x1xf32>
    %67 = vector.broadcast %66 : vector<8x1xf32> to vector<8x8xf32>
    %68 = arith.subf %64, %67 : vector<8x8xf32>
    %69 = math.exp %68 : vector<8x8xf32>
    %cst_38 = arith.constant dense<0.000000e+00> : vector<8xf32>
    %70 = vector.multi_reduction <add>, %69, %cst_38 [1] : vector<8x8xf32> to vector<8xf32>
    %71 = vector.shape_cast %70 : vector<8xf32> to vector<8x1xf32>
    %72 = tpu.reciprocal %71 {approx = true} : vector<8x1xf32> -> vector<8x1xf32>
    %73 = vector.broadcast %72 : vector<8x1xf32> to vector<8x8xf32>
    %74 = arith.mulf %69, %73 : vector<8x8xf32>
    %cst_39 = arith.constant dense<0.000000e+00> : vector<8x16xf32>
    %75 = tpu.matmul %74, %63, %cst_39 {dimension_numbers = #tpu.dot_dimension_numbers<[1], [0], [0], [1], [0, 0, 1, 1], [], []>} : vector<8x8xf32>, vector<8x16xf32>, vector<8x16xf32> -> vector<8x16xf32>
    %76 = vector.extract_strided_slice %23 {offsets = [0, 32], sizes = [32, 16], strides = [1, 1]} : vector<32x64xf32> to vector<32x16xf32>
    %cst_40 = arith.constant dense<0.000000e+00> : vector<8x32xf32>
    %77 = tpu.matmul %75, %76, %cst_40 {dimension_numbers = #tpu.dot_dimension_numbers<[1], [1], [0], [0], [0, 0, 1, 0], [], []>} : vector<8x16xf32>, vector<32x16xf32>, vector<8x32xf32> -> vector<8x32xf32>
    %78 = arith.addf %60, %77 : vector<8x32xf32>
    %79 = vector.extract_strided_slice %12 {offsets = [0, 48], sizes = [8, 16], strides = [1, 1]} : vector<8x64xf32> to vector<8x16xf32>
    %80 = vector.extract_strided_slice %17 {offsets = [0, 48], sizes = [8, 16], strides = [1, 1]} : vector<8x64xf32> to vector<8x16xf32>
    %81 = vector.extract_strided_slice %22 {offsets = [0, 48], sizes = [8, 16], strides = [1, 1]} : vector<8x64xf32> to vector<8x16xf32>
    %cst_41 = arith.constant dense<0.000000e+00> : vector<8x8xf32>
    %82 = tpu.matmul %79, %80, %cst_41 {dimension_numbers = #tpu.dot_dimension_numbers<[1], [1], [0], [0], [0, 0, 1, 0], [], []>} : vector<8x16xf32>, vector<8x16xf32>, vector<8x8xf32> -> vector<8x8xf32>
    %cst_42 = arith.constant dense<0xFF800000> : vector<8xf32>
    %83 = vector.multi_reduction <maximumf>, %82, %cst_42 [1] : vector<8x8xf32> to vector<8xf32>
    %84 = vector.shape_cast %83 : vector<8xf32> to vector<8x1xf32>
    %85 = vector.broadcast %84 : vector<8x1xf32> to vector<8x8xf32>
    %86 = arith.subf %82, %85 : vector<8x8xf32>
    %87 = math.exp %86 : vector<8x8xf32>
    %cst_43 = arith.constant dense<0.000000e+00> : vector<8xf32>
    %88 = vector.multi_reduction <add>, %87, %cst_43 [1] : vector<8x8xf32> to vector<8xf32>
    %89 = vector.shape_cast %88 : vector<8xf32> to vector<8x1xf32>
    %90 = tpu.reciprocal %89 {approx = true} : vector<8x1xf32> -> vector<8x1xf32>
    %91 = vector.broadcast %90 : vector<8x1xf32> to vector<8x8xf32>
    %92 = arith.mulf %87, %91 : vector<8x8xf32>
    %cst_44 = arith.constant dense<0.000000e+00> : vector<8x16xf32>
    %93 = tpu.matmul %92, %81, %cst_44 {dimension_numbers = #tpu.dot_dimension_numbers<[1], [0], [0], [1], [0, 0, 1, 1], [], []>} : vector<8x8xf32>, vector<8x16xf32>, vector<8x16xf32> -> vector<8x16xf32>
    %94 = vector.extract_strided_slice %23 {offsets = [0, 48], sizes = [32, 16], strides = [1, 1]} : vector<32x64xf32> to vector<32x16xf32>
    %cst_45 = arith.constant dense<0.000000e+00> : vector<8x32xf32>
    %95 = tpu.matmul %93, %94, %cst_45 {dimension_numbers = #tpu.dot_dimension_numbers<[1], [1], [0], [0], [0, 0, 1, 0], [], []>} : vector<8x16xf32>, vector<32x16xf32>, vector<8x32xf32> -> vector<8x32xf32>
    %96 = arith.addf %78, %95 : vector<8x32xf32>
    %c0_46 = arith.constant 0 : index
    %c0_47 = arith.constant 0 : index
    %97 = vector.load %arg11[%c0_46, %c0_47] : memref<1x32xf32, #tpu.memory_space<vmem>>, vector<1x32xf32>
    %98 = vector.broadcast %97 : vector<1x32xf32> to vector<8x32xf32>
    %99 = arith.addf %96, %98 : vector<8x32xf32>
    %c0_48 = arith.constant 0 : index
    %c0_49 = arith.constant 0 : index
    %c0_50 = arith.constant 0 : index
    %100 = vector.load %arg12[%c0_48, %c0_49, %c0_50] : memref<1x8x32xf32, #tpu.memory_space<vmem>>, vector<1x8x32xf32>
    %101 = vector.shape_cast %100 : vector<1x8x32xf32> to vector<8x32xf32>
    %102 = vector.shape_cast %99 : vector<8x32xf32> to vector<1x8x32xf32>
    tpu.vector_store %arg12[%c0_48, %c0_49, %c0_50], %102 {strides = array<i32>} : memref<1x8x32xf32, #tpu.memory_space<vmem>>, vector<1x8x32xf32>,
    return
  }
  func.func @transform_0(%arg0: i32) -> (i32, i32, i32) {
    %c0_i32 = arith.constant 0 : i32
    %c0_i32_0 = arith.constant 0 : i32
    %c0_i32_1 = arith.constant 0 : i32
    return %arg0, %c0_i32, %c0_i32_0 : i32, i32, i32
  }
  func.func @transform_1(%arg0: i32) -> (i32, i32, i32) {
    %c0_i32 = arith.constant 0 : i32
    %c0_i32_0 = arith.constant 0 : i32
    %c0_i32_1 = arith.constant 0 : i32
    return %arg0, %c0_i32, %c0_i32_0 : i32, i32, i32
  }
  func.func @transform_2(%arg0: i32) -> (i32, i32, i32) {
    %c0_i32 = arith.constant 0 : i32
    %c0_i32_0 = arith.constant 0 : i32
    %c0_i32_1 = arith.constant 0 : i32
    return %arg0, %c0_i32, %c0_i32_0 : i32, i32, i32
  }
  func.func @transform_3(%arg0: i32) -> (i32, i32) {
    %c0_i32 = arith.constant 0 : i32
    %c0_i32_0 = arith.constant 0 : i32
    %c0_i32_1 = arith.constant 0 : i32
    return %c0_i32, %c0_i32_0 : i32, i32
  }
  func.func @transform_4(%arg0: i32) -> (i32, i32) {
    %c0_i32 = arith.constant 0 : i32
    %c0_i32_0 = arith.constant 0 : i32
    %c0_i32_1 = arith.constant 0 : i32
    return %c0_i32, %c0_i32_0 : i32, i32
  }
  func.func @transform_5(%arg0: i32) -> (i32, i32) {
    %c0_i32 = arith.constant 0 : i32
    %c0_i32_0 = arith.constant 0 : i32
    %c0_i32_1 = arith.constant 0 : i32
    return %c0_i32, %c0_i32_0 : i32, i32
  }
  func.func @transform_6(%arg0: i32) -> (i32, i32) {
    %c0_i32 = arith.constant 0 : i32
    %c0_i32_0 = arith.constant 0 : i32
    %c0_i32_1 = arith.constant 0 : i32
    return %c0_i32, %c0_i32_0 : i32, i32
  }
  func.func @transform_7(%arg0: i32) -> (i32, i32) {
    %c0_i32 = arith.constant 0 : i32
    %c0_i32_0 = arith.constant 0 : i32
    %c0_i32_1 = arith.constant 0 : i32
    return %c0_i32, %c0_i32_0 : i32, i32
  }
  func.func @transform_8(%arg0: i32) -> (i32, i32) {
    %c0_i32 = arith.constant 0 : i32
    %c0_i32_0 = arith.constant 0 : i32
    %c0_i32_1 = arith.constant 0 : i32
    return %c0_i32, %c0_i32_0 : i32, i32
  }
  func.func @transform_9(%arg0: i32) -> (i32, i32) {
    %c0_i32 = arith.constant 0 : i32
    %c0_i32_0 = arith.constant 0 : i32
    %c0_i32_1 = arith.constant 0 : i32
    return %c0_i32, %c0_i32_0 : i32, i32
  }
  func.func @transform_10(%arg0: i32) -> (i32, i32) {
    %c0_i32 = arith.constant 0 : i32
    %c0_i32_0 = arith.constant 0 : i32
    %c0_i32_1 = arith.constant 0 : i32
    return %c0_i32, %c0_i32_0 : i32, i32
  }
  func.func @transform_11(%arg0: i32) -> (i32, i32, i32) {
    %c0_i32 = arith.constant 0 : i32
    %c0_i32_0 = arith.constant 0 : i32
    %c0_i32_1 = arith.constant 0 : i32
    return %arg0, %c0_i32, %c0_i32_0 : i32, i32, i32
  }
}

</mosaic_0001>

<bundles_post_ra>
// kernel: tpu_custom_call.1
= control target key start
LH: loop header
LB: loop body
LE: loop exit
PB: predicated region body
PF: predicated region fallthrough
CT: control target
= control target key end

     0   :  { %s2848_s0 = inlined_call_operand.vmem [shape: f32[2,8,32], index: 0, kind: input, shape index: {}]   ;;  %s2849_s1 = inlined_call_operand.vmem [shape: f32[2,8,32], index: 1, kind: input, shape index: {}]   ;;  %s2850_s2 = inlined_call_operand.vmem [shape: f32[2,8,32], index: 2, kind: input, shape index: {}]   ;;  %s2851_s3 = inlined_call_operand.vmem [shape: f32[64,32], index: 3, kind: input, shape index: {}]   ;;  %s2852_s4 = inlined_call_operand.vmem [shape: f32[1,64], index: 4, kind: input, shape index: {}]   ;;  %s2853_s5 = inlined_call_operand.vmem [shape: f32[64,32], index: 5, kind: input, shape index: {}]   ;;  %s2854_s6 = inlined_call_operand.vmem [shape: f32[1,64], index: 6, kind: input, shape index: {}]   ;;  %s2855_s7 = inlined_call_operand.vmem [shape: f32[64,32], index: 7, kind: input, shape index: {}]   ;;  %s2856_s8 = inlined_call_operand.vmem [shape: f32[1,64], index: 8, kind: input, shape index: {}]   ;;  %s2857_s9 = inlined_call_operand.vmem [shape: f32[32,64], index: 9, kind: input, shape index: {}]   ;;  %s2858_s10 = inlined_call_operand.vmem [shape: f32[1,32], index: 10, kind: input, shape index: {}]   ;;  %s2859_s11 = inlined_call_operand.hbm [shape: f32[2,8,32], index: 11, kind: output, shape index: {}]  }
   0x1   :  { %2860 = sst [smem:[#allocation5_spill]] %s2848_s0 }
   0x2   :  { %16 = vsyncpa [#allocation3], 0 }
   0x3   :  { %18 = vsyncpa [#allocation3 + $0x1], 0  ;;  %s2460_s17 = smov 0   ;;  %s2462_s18 = smov 0  }
   0x4   :  { %s2464_s19 = smov 0   ;;  %s2466_s20 = smov 0  }
   0x5 LB: > { %s2481_s21 = sadd.s32 4294967295, %s2391_s20   ;;  %s1879_s22 = sadd.s32 4294967294, %s2391_s20   ;;  %s2391_s20 = sphi %s2466_s20, %s2871_s20   ;;  %s2387_s19 = sphi %s2464_s19, %s2870_s19   ;;  %s2383_s18 = sphi %s2462_s18, %s2869_s18   ;;  %s2379_s17 = sphi %s2460_s17, %s2868_s17  }
   0x6   : > { %s2485_s23 = sadd.s32 1, %s2391_s20   ;;  %s277_s24 = sadd.s32 1, %s2387_s19 }
   0x7   : > { %s274_s25 = ssub.s32 %s2391_s20, %s2485_s23  ;;  %p287_p0 = scmp.ne.s32.totalorder %s2387_s19, %s2383_s18 }
   0x8   : > { %p275_p1 = scmp.eq.s32.totalorder %s274_s25, 0  ;;  %p288_p2 = scmp.eq.s32.totalorder %s2481_s21, 1 }
   0x9   : > { %p293_p3 = scmp.ne.s32.totalorder %s2383_s18, %s2379_s17  ;;  %p294_p4 = scmp.eq.s32.totalorder %s1879_s22, 1 }
   0xa   : > { %s2496_s26 = scalar_select %p275_p1, %s2387_s19, %s277_s24  }
   0xb   : > { %p2498_p5 = por %p288_p2, %p287_p0  ;;  %p2502_p6 = por %p294_p4, %p293_p3 }
   0xc   : > { %p1882_p7 = scmp.ge.s32.totalorder %s2391_s20, 1  ;;  %p357_p8 = scmp.lt.s32.totalorder %s2391_s20, 3 }
   0xe   : > { %p358_p9 = pnand %p1882_p7, %p357_p8 }
   0xf   : > { %vm434_vm0 = vcmask (!%p358_p9), 261120   ;;  %v533_v0 = vld [vmem:[%s2853_s5] sm:$0xff] (!%p358_p9)  ;;  %v534_v1 = vld [vmem:[%s2853_s5 + $0x8] sm:$0xff] (!%p358_p9)  ;;  %v2393_v3 = vmov (!%p358_p9), 0.0|0.0   ;;  %vm2394_vm2 = vmmov (!%p358_p9), 0   ;;  %v2395_v8 = vmov (!%p358_p9), 0.0  }
  0x10   : > { %361 = sbr.rel (%p358_p9) target bundleno = 3248 (0xcb0), region = 64  ;;  %v419_v2 = vld [vmem:[%s2851_s3] sm:$0xff] (!%p358_p9)  ;;  %2174 = vmatprep.subr.bf16.mxu1 (!%p358_p9), %v2393_v3  ;;  %2158 = vmatprep.subr.bf16.mxu0 (!%p358_p9), %v2393_v3  ;;  %vm2521_vm1 = vmpackc.low (!%p358_p9), %vm434_vm0, %vm434_vm0  ;;  %v2175_v5 = vpack.c.bf16 (!%p358_p9), %v534_v1, %v533_v0  ;;  %v420_v6 = vld [vmem:[%s2851_s3 + $0x8] sm:$0xff] (!%p358_p9)  ;;  %p404_p10 = scmp.lt.s32.totalorder (!%p358_p9), %s2481_s21, 1  ;;  %vm761_vm3 = vcmask (!%p358_p9), 130048   ;;  %vm838_vm4 = vcmask (!%p358_p9), 64512  }
  0x11   : > { %v2159_v7 = vpack.c.bf16 (!%p358_p9), %v420_v6, %v419_v2  ;;  %2052 = vmatprep.mubr.msk.f32.mxu1 (!%p358_p9), %vm2394_vm2, %v2395_v8  ;;  %2033 = vmatprep.mubr.msk.f32.mxu0 (!%p358_p9), %vm2394_vm2, %v2395_v8  ;;  %v535_v9 = vld [vmem:[%s2853_s5 + $0x10] sm:$0xff] (!%p358_p9)  ;;  %v536_v10 = vld [vmem:[%s2853_s5 + $0x18] sm:$0xff] (!%p358_p9)  ;;  %v537_v15 = vld [vmem:[%s2853_s5 + $0x20] sm:$0xff] (!%p358_p9)  ;;  %s2865_s0 = sld [smem:[#allocation5_spill]] (!%p358_p9)  ;;  %s2396_s15 = smov (!%p358_p9), 112  }
  0x12   : > { %2177 = vmatpush3.bf16.xpose.msk.msra.mxu1 (!%p358_p9), %vm2521_vm1, %v2175_v5  ;;  %v421_v11 = vld [vmem:[%s2851_s3 + $0x10] sm:$0xff] (!%p358_p9)  ;;  %v422_v12 = vld [vmem:[%s2851_s3 + $0x18] sm:$0xff] (!%p358_p9)  ;;  %v2179_v13 = vpack.c.bf16 (!%p358_p9), %v536_v10, %v535_v9  ;;  %v538_v16 = vld [vmem:[%s2853_s5 + $0x28] sm:$0xff] (!%p358_p9)  ;;  %s401_s29 = sand.u32 (!%p358_p9), 1, %s2383_s18  }
  0x13   : > { %2161 = vmatpush3.bf16.xpose.msk.msra.mxu0 (!%p358_p9), %vm2521_vm1, %v2159_v7  ;;  %2178 = vmatprep.subr.bf16.mxu1 (!%p358_p9), %v2393_v3  ;;  %v2163_v14 = vpack.c.bf16 (!%p358_p9), %v422_v12, %v421_v11  ;;  %v423_v17 = vld [vmem:[%s2851_s3 + $0x20] sm:$0xff] (!%p358_p9)  ;;  %v424_v18 = vld [vmem:[%s2851_s3 + $0x28] sm:$0xff] (!%p358_p9)  ;;  %v2183_v19 = vpack.c.bf16 (!%p358_p9), %v538_v16, %v537_v15  ;;  %v539_v21 = vld [vmem:[%s2853_s5 + $0x30] sm:$0xff] (!%p358_p9)  ;;  %s1883_s30 = sshll.u32 (!%p358_p9), %s401_s29, 3 }
  0x14   : > { %2162 = vmatprep.subr.bf16.mxu0 (!%p358_p9), %v2393_v3  ;;  %v2167_v20 = vpack.c.bf16 (!%p358_p9), %v424_v18, %v423_v17  ;;  %v540_v22 = vld [vmem:[%s2853_s5 + $0x38] sm:$0xff] (!%p358_p9)  ;;  %v425_v23 = vld [vmem:[%s2851_s3 + $0x30] sm:$0xff] (!%p358_p9)  ;;  %v1897_v29 = vld [vmem:[%s2854_s6] ss:$0 sm:$0xff] (!%p358_p9)  ;;  %s403_s22 = scalar_lea.vmem (!%p358_p9), [#allocation2], %s1883_s30 }
  0x15   : > { %v426_v24 = vld [vmem:[%s2851_s3 + $0x38] sm:$0xff] (!%p358_p9)  ;;  %v2187_v25 = vpack.c.bf16 (!%p358_p9), %v540_v22, %v539_v21  ;;  %v1887_v30 = vld [vmem:[%s2852_s4] ss:$0 sm:$0xff] (!%p358_p9)  ;;  %v646_v39 = vld [vmem:[%s2855_s7 + $0x8] sm:$0xff] (!%p358_p9) }
  0x16   : > { %v2171_v26 = vpack.c.bf16 (!%p358_p9), %v426_v24, %v425_v23  ;;  %v645_v38 = vld [vmem:[%s2855_s7] sm:$0xff] (!%p358_p9)  ;;  %v647_v41 = vld [vmem:[%s2855_s7 + $0x10] sm:$0xff] (!%p358_p9)  ;;  %v648_v42 = vld [vmem:[%s2855_s7 + $0x18] sm:$0xff] (!%p358_p9) }
  0x17   : > { %s405_s12 = scalar_select %p404_p10, %s2481_s21, 1  ;;  %v2191_v40 = vpack.c.bf16 %v646_v39, %v645_v38  ;;  %v2195_v43 = vpack.c.bf16 %v648_v42, %v647_v41  ;;  %v649_v44 = vld [vmem:[%s2855_s7 + $0x20] sm:$0xff]  ;;  %v650_v45 = vld [vmem:[%s2855_s7 + $0x28] sm:$0xff]  ;;  %v651_v47 = vld [vmem:[%s2855_s7 + $0x30] sm:$0xff] }
  0x18   : > { %v2199_v46 = vpack.c.bf16 %v650_v45, %v649_v44  ;;  %v652_v48 = vld [vmem:[%s2855_s7 + $0x38] sm:$0xff]  ;;  %v1907_v59 = vld [vmem:[%s2856_s8] ss:$0 sm:$0xff]  ;;  %v758_v0 = vld [vmem:[%s2857_s9 + $0x8] sm:$0xff] }
  0x19   : > { %s2588_s13 = sshll.u32 %s405_s12, 3  ;;  %v2203_v49 = vpack.c.bf16 %v652_v48, %v651_v47  ;;  %v757_v63 = vld [vmem:[%s2857_s9] sm:$0xff]  ;;  %vm2691_vm5 = vmpackc.low %vm761_vm3, %vm761_vm3  ;;  %v759_v4 = vld [vmem:[%s2857_s9 + $0x10] sm:$0xff]  ;;  %s1783_s12 = scalar_lea.sflag [#allocation3], %s401_s29 }
  0x1a   : > { %2181 = vmatpush3.bf16.xpose.msk.msra.mxu1 %vm2521_vm1, %v2179_v13  ;;  %s411_s16 = scalar_lea.vmem %s2849_s1, %s2588_s13  ;;  %s407_s25 = scalar_lea.vmem %s2865_s0, %s2588_s13  ;;  %v2215_v2 = vpack.c.bf16 %v758_v0, %v757_v63  ;;  %v760_v5 = vld [vmem:[%s2857_s9 + $0x18] sm:$0xff]  ;;  %v2721_v18 = vpack.i.bf16 %v758_v0, %v757_v63 }
  0x1b   : > { %2165 = vmatpush3.bf16.xpose.msk.msra.mxu0 %vm2521_vm1, %v2163_v14  ;;  %2182 = vmatprep.subr.bf16.mxu1 %v2393_v3  ;;  %v417_v27 = vld [vmem:[%s411_s16] sm:$0xff]  ;;  %s415_s24 = scalar_lea.vmem %s2850_s2, %s2588_s13  ;;  %v2219_v6 = vpack.c.bf16 %v760_v5, %v759_v4  ;;  %s1951_s16 = sshll.u32 %s2481_s21, 7 }
  0x1c   : > { %2166 = vmatprep.subr.bf16.mxu0 %v2393_v3  ;;  %v416_v28 = vld [vmem:[%s407_s25] sm:$0xff]  ;;  %s2397_s25 = smov 96   ;;  %s2399_s21 = smov [#allocation2]  }
  0x1d   : > { %v418_v50 = vld [vmem:[%s415_s24] sm:$0xff]  ;;  %s1796_s24 = sshll.u32 %s403_s22, 4  ;;  %s2333_s30 = sshll.u32 %s2399_s21, 4  ;;  %s2807_s24 = int_to_ptr.vmem [resolvable:$true] %s1796_s24  ;;  %s2334_s30 = int_to_ptr.vmem [resolvable:$false] %s2333_s30 }
  0x1e   : > { %s2329_s14 = scalar_lea.vmem %s2807_s24, 128  ;;  %s2335_s0 = scalar_lea.vmem %s2334_s30, 256 }
  0x1f   : > { %p2330_p11 = scmp.ne.s32.totalorder %s2807_s24, %s2329_s14  ;;  %p2336_p0 = scmp.lt.s32.totalorder %s2807_s24, %s2334_s30 }
  0x20   : > { %p2337_p1 = scmp.lt.s32.totalorder %s2335_s0, %s2329_s14 }
  0x21   : > { %p2331_p12 = pnand %p2330_p11, %p2498_p5 }
  0x22   : > { %2185 = vmatpush3.bf16.xpose.msk.msra.mxu1 %vm2521_vm1, %v2183_v19  ;;  %v2725_v19 = vpack.i.bf16 %v760_v5, %v759_v4  ;;  %p2338_p2 = por %p2337_p1, %p2336_p0 }
  0x23   : > { %2169 = vmatpush3.bf16.xpose.msk.msra.mxu0 %vm2521_vm1, %v2167_v20  ;;  %2186 = vmatprep.subr.bf16.mxu1 %v2393_v3  ;;  %p2332_p13 = pneg %p2331_p12 }
  0x24   : > { %2170 = vmatprep.subr.bf16.mxu0 %v2393_v3 }
  0x25   : > { %p2339_p3 = pnand %p2338_p2, %p2332_p13 }
  0x2a   : > { %2189 = vmatpush3.bf16.xpose.msk.msra.mxu1 %vm2521_vm1, %v2187_v25 }
  0x2b   : > { %2173 = vmatpush3.bf16.xpose.msk.msra.mxu0 %vm2521_vm1, %v2171_v26  ;;  %2074 = vmatprep.subr.mxu1 %v2395_v8 }
  0x2c   : > { %2190 = vmatprep.subr.bf16.mxu0 %v2393_v3 }
  0x31   : > { %2053 = vmatmul.mubr.msk.f32.vlgmr.msra.gmra.mrb[0].mxu1 %vm434_vm0, %v417_v27 }
  0x32   : > { %2034 = vmatmul.mubr.msk.f32.vlgmr.msra.gmra.mrb[0].mxu0 %vm434_vm0, %v416_v28  ;;  %2076 = vmatprep.mubr.msk.f32.mxu1 %vm2394_vm2, %v2395_v8 }
  0x33   : > { %2071 = vmatprep.mubr.msk.f32.mxu0 %vm2394_vm2, %v2395_v8  ;;  %2193 = vmatpush3.bf16.xpose.msk.msra.mxu0 %vm2521_vm1, %v2191_v40 }
  0x34   : > { %2194 = vmatprep.subr.bf16.mxu0 %v2393_v3 }
  0x3b   : > { %2197 = vmatpush3.bf16.xpose.msk.msra.mxu0 %vm2521_vm1, %v2195_v43 }
  0x3c   : > { %2198 = vmatprep.subr.bf16.mxu0 %v2393_v3 }
  0x43   : > { %2201 = vmatpush3.bf16.xpose.msk.msra.mxu0 %vm2521_vm1, %v2199_v46 }
  0x44   : > { %2202 = vmatprep.subr.bf16.mxu0 %v2393_v3 }
  0x4b   : > { %2205 = vmatpush3.bf16.xpose.msk.msra.mxu0 %vm2521_vm1, %v2203_v49 }
  0x4c   : > { %2214 = vmatprep.subr.bf16.mxu0 %v2393_v3 }
  0x52   : > { %2072 = vmatmul.mubr.msk.f32.vlgmr.msra.gmra.mrb[2].mxu0 %vm434_vm0, %v418_v50 }
  0x53   : > { %2113 = vmatprep.mubr.msk.f32.mxu0 %vm2394_vm2, %v2395_v8  ;;  %2217 = vmatpush3.bf16.xpose.msk.msra.mxu0 %vm2691_vm5, %v2215_v2 }
  0x54   : > { %2218 = vmatprep.subr.bf16.mxu0 %v2393_v3 }
  0x5b   : > { %2221 = vmatpush3.bf16.xpose.msk.msra.mxu0 %vm2691_vm5, %v2219_v6 }
  0x5c   : > { %2230 = vmatprep.subr.bf16.mxu0 %v2393_v3 }
 0x104   : > { %v641_v31 = vpop.f32.mrb[0].mxu1 }
 0x105   : > { %v2616_v32 = vadd.f32 %v1897_v29, %v641_v31  ;;  %v528_v33 = vpop.f32.mrb[0].mxu0  ;;  %v2054_v34 = vpop.f32.mrb[1].mxu1 }
 0x106   : > { %v529_v35 = vadd.f32 %v1887_v30, %v528_v33  ;;  %v2035_v36 = vpop.f32.mrb[1].mxu0 }
 0x107   : > { %925 = vrot.lane.b32.xlu1 %v2616_v32, %s2396_s15  ;;  %2075 = vmatpush3.xpose.msk.msra.mxu1 %vm761_vm3, %v2616_v32 }
 0x108   : > { %v2622_v37 = vmul.f32 0.25, %v529_v35  ;;  %2079 = vmatprep.subr.mxu1 %v2395_v8 }
 0x10a   : > { %2077 = vmatmul.mubr.msk.f32.vlgmr.msra.gmra.mrb[2].mxu1 %vm761_vm3, %v2622_v37 }
 0x10b   : > { %923 = vrot.lane.b32.xlu1 %v2622_v37, %s2396_s15  ;;  %2081 = vmatprep.mubr.msk.f32.mxu1 %vm2394_vm2, %v2395_v8 }
 0x125   : > { %v753_v60 = vpop.f32.mrb[2].mxu0 }
 0x126   : > { %v2679_v61 = vadd.f32 %v1907_v59, %v753_v60  ;;  %v2073_v62 = vpop.f32.mrb[3].mxu0 }
 0x128   : > { %2080 = vmatpush3.msra.mxu1 %v2679_v61 }
 0x129   : > { %2084 = vmatprep.subr.mxu1 %v2395_v8 }
 0x179   : > { %v926_v10 = vpop.permute.xlu1 %925 }
 0x17d   : > { %v924_v12 = vpop.permute.xlu1 %923 }
 0x1dd   : > { %v834_v51 = vpop.f32.mrb[2].mxu1 }
 0x1de   : > { %v2078_v52 = vpop.f32.mrb[3].mxu1  ;;  %v839_v53 = vsel %vm838_vm4, %v834_v51, -inf }
 0x1df   : > { %840 = vmax.xlane.f32.xlu0 %v839_v53 }
 0x26c   : > { %v841_v54 = vpop.xlane.xlu0 %840 }
 0x26d   : > { %v842_v55 = vsub.f32 %v834_v51, %v841_v54 }
 0x26f   : > { %v843_v56 = vmul.f32 1.442695, %v842_v55 }
 0x271   : > { %2313 = vpow2.f32 %v843_v56 }
 0x27b   : > { %v2314_v57 = vpop.eup %2313 }
 0x27c   : > { %v845_v58 = vsel %vm838_vm4, %v2314_v57, 0.0 }
 0x27d   : > { %846 = vadd.xlane.f32.xlu0 %v845_v58 }
 0x30a   : > { %v847_v7 = vpop.xlane.xlu0 %846 }
 0x30b   : > { %2315 = vrcp.f32 %v847_v7 }
 0x315   : > { %v2316_v9 = vpop.eup %2315 }
 0x316   : > { %v849_v11 = vmul.f32 %v2316_v9, %v2314_v57 }
 0x318   : > { %2082 = vmatmul.mubr.msk.f32.vlgmr.msra.gmra.mrb[4].mxu1 %vm838_vm4, %v849_v11 }
 0x319   : > { %2085 = vmatpush3.xpose.msk.msra.mxu1 %vm761_vm3, %v926_v10  ;;  %2086 = vmatprep.mubr.msk.f32.mxu1 %vm2394_vm2, %v2395_v8 }
 0x31a   : > { %2089 = vmatprep.subr.mxu1 %v2395_v8 }
 0x31c   : > { %2087 = vmatmul.mubr.msk.f32.vlgmr.msra.gmra.mrb[6].mxu1 %vm761_vm3, %v924_v12 }
 0x31d   : > { %2091 = vmatprep.mubr.msk.f32.mxu1 %vm2394_vm2, %v2395_v8 }
 0x3eb   : > { %v919_v13 = vpop.f32.mrb[4].mxu1 }
 0x3ec   : > { %v2083_v14 = vpop.f32.mrb[5].mxu1  ;;  %2114 = vmatmul.mubr.msk.f32.vlgmr.msra.gmra.mrb[4].mxu0 %vm761_vm3, %v919_v13 }
 0x3ed   : > { %2155 = vmatprep.mubr.msk.f32.mxu0 %vm2394_vm2, %v2395_v8 }
 0x3ef   : > { %v997_v15 = vpop.f32.mrb[6].mxu1 }
 0x3f0   : > { %v2088_v16 = vpop.f32.mrb[7].mxu1  ;;  %v1001_v17 = vsel %vm838_vm4, %v997_v15, -inf }
 0x3f1   : > { %1002 = vmax.xlane.f32.xlu0 %v1001_v17 }
 0x407   : > { %1013 = vrot.lane.b32.xlu0 %v2679_v61, %s2396_s15 }
 0x40b   : > { %2284 = vrot.lane.b32.xlu0 %v2721_v18, %s2396_s15 }
 0x40f   : > { %2289 = vrot.lane.b32.xlu0 %v2725_v19, %s2396_s15  ;;  %s2398_s15 = smov 80  }
 0x413   : > { %1265 = vrot.lane.b32.xlu0 %v2616_v32, %s2397_s25 }
 0x47e   : > { %v1003_v20 = vpop.xlane.xlu0 %1002 }
 0x47f   : > { %v1004_v21 = vsub.f32 %v997_v15, %v1003_v20 }
 0x481   : > { %v1005_v22 = vmul.f32 1.442695, %v1004_v21 }
 0x482   : > { %v1014_v23 = vpop.permute.xlu0 %1013 }
 0x483   : > { %2317 = vpow2.f32 %v1005_v22  ;;  %2090 = vmatpush3.msra.mxu1 %v1014_v23 }
 0x484   : > { %2206 = vmatprep.subr.bf16.mxu1 %v2393_v3 }
 0x486   : > { %v2285_v29 = vpop.permute.xlu0 %2284 }
 0x487   : > { %v2287_v30 = vunpack.i.h.bf16 %v2285_v29  ;;  %v2286_v31 = vunpack.i.l.bf16 %v2285_v29 }
 0x489   : > { %v2207_v34 = vpack.c.bf16 %v2287_v30, %v2286_v31 }
 0x48a   : > { %v2290_v36 = vpop.permute.xlu0 %2289 }
 0x48b   : > { %v2292_v38 = vunpack.i.h.bf16 %v2290_v36  ;;  %v2291_v39 = vunpack.i.l.bf16 %v2290_v36 }
 0x48d   : > { %v2318_v24 = vpop.eup %2317  ;;  %v2211_v40 = vpack.c.bf16 %v2292_v38, %v2291_v39 }
 0x48e   : > { %v1007_v25 = vsel %vm838_vm4, %v2318_v24, 0.0  ;;  %v1266_v42 = vpop.permute.xlu0 %1265 }
 0x48f   : > { %1008 = vadd.xlane.f32.xlu1 %v1007_v25 }
 0x4a0   : > { %1263 = vrot.lane.b32.xlu1 %v2622_v37, %s2397_s25 }
 0x4bf   : > { %v1259_v26 = vpop.f32.mrb[4].mxu0 }
 0x4c0   : > { %v2115_v27 = vpop.f32.mrb[5].mxu0 }
 0x51c   : > { %v1009_v28 = vpop.xlane.xlu1 %1008 }
 0x51d   : > { %2319 = vrcp.f32 %v1009_v28 }
 0x520   : > { %v1264_v44 = vpop.permute.xlu1 %1263 }
 0x527   : > { %v2320_v33 = vpop.eup %2319 }
 0x528   : > { %v1011_v35 = vmul.f32 %v2320_v33, %v2318_v24 }
 0x52a   : > { %2092 = vmatmul.mubr.msk.f32.vlgmr.msra.gmra.mrb[8].mxu1 %vm838_vm4, %v1011_v35 }
 0x52b   : > { %2209 = vmatpush3.bf16.xpose.msk.msra.mxu1 %vm2691_vm5, %v2207_v34  ;;  %2102 = vmatprep.mubr.msk.f32.mxu1 %vm2394_vm2, %v2395_v8 }
 0x52c   : > { %2210 = vmatprep.subr.bf16.mxu1 %v2393_v3 }
 0x533   : > { %2213 = vmatpush3.bf16.xpose.msk.msra.mxu1 %vm2691_vm5, %v2211_v40 }
 0x534   : > { %2116 = vmatprep.subr.mxu1 %v2395_v8 }
 0x5fd   : > { %v1085_v41 = vpop.f32.mrb[8].mxu1 }
 0x5fe   : > { %v2093_v43 = vpop.f32.mrb[9].mxu1  ;;  %2103 = vmatmul.mubr.msk.f32.vlgmr.msra.gmra.mrb[10].mxu1 %vm761_vm3, %v1085_v41 }
 0x5ff   : > { %2117 = vmatpush3.xpose.msk.msra.mxu1 %vm761_vm3, %v1266_v42  ;;  %2118 = vmatprep.mubr.msk.f32.mxu1 %vm2394_vm2, %v2395_v8 }
 0x600   : > { %2121 = vmatprep.subr.mxu1 %v2395_v8 }
 0x602   : > { %2119 = vmatmul.mubr.msk.f32.vlgmr.msra.gmra.mrb[12].mxu1 %vm761_vm3, %v1264_v44 }
 0x603   : > { %2123 = vmatprep.mubr.msk.f32.mxu1 %vm2394_vm2, %v2395_v8 }
 0x6d1   : > { %v1178_v45 = vpop.f32.mrb[10].mxu1 }
 0x6d2   : > { %v1260_v46 = vadd.f32 %v1259_v26, %v1178_v45  ;;  %v2104_v47 = vpop.f32.mrb[11].mxu1 }
 0x6d5   : > { %v1337_v48 = vpop.f32.mrb[12].mxu1 }
 0x6d6   : > { %v2120_v49 = vpop.f32.mrb[13].mxu1  ;;  %v1341_v50 = vsel %vm838_vm4, %v1337_v48, -inf }
 0x6d7   : > { %1342 = vmax.xlane.f32.xlu0 %v1341_v50 }
 0x6ed   : > { %1352 = vrot.lane.b32.xlu0 %v2679_v61, %s2397_s25 }
 0x6f1   : > { %2299 = vrot.lane.b32.xlu0 %v2725_v19, %s2397_s25 }
 0x6f5   : > { %1520 = vrot.lane.b32.xlu0 %v2616_v32, %s2398_s15 }
 0x6f9   : > { %1518 = vrot.lane.b32.xlu0 %v2622_v37, %s2398_s15 }
 0x764   : > { %v1343_v51 = vpop.xlane.xlu0 %1342 }
 0x765   : > { %v1344_v52 = vsub.f32 %v1337_v48, %v1343_v51 }
 0x767   : > { %v1345_v53 = vmul.f32 1.442695, %v1344_v52 }
 0x768   : > { %v1353_v54 = vpop.permute.xlu0 %1352 }
 0x769   : > { %2321 = vpow2.f32 %v1345_v53  ;;  %2122 = vmatpush3.msra.mxu1 %v1353_v54 }
 0x76a   : > { %2222 = vmatprep.subr.bf16.mxu1 %v2393_v3 }
 0x76c   : > { %v2300_v63 = vpop.permute.xlu0 %2299 }
 0x76d   : > { %v2302_v0 = vunpack.i.h.bf16 %v2300_v63  ;;  %v2301_v2 = vunpack.i.l.bf16 %v2300_v63 }
 0x76f   : > { %v2227_v4 = vpack.c.bf16 %v2302_v0, %v2301_v2 }
 0x770   : > { %v1521_v5 = vpop.permute.xlu0 %1520 }
 0x773   : > { %v2322_v55 = vpop.eup %2321 }
 0x774   : > { %v1347_v56 = vsel %vm838_vm4, %v2322_v55, 0.0  ;;  %v1519_v9 = vpop.permute.xlu0 %1518 }
 0x775   : > { %1348 = vadd.xlane.f32.xlu1 %v1347_v56 }
 0x786   : > { %2294 = vrot.lane.b32.xlu1 %v2721_v18, %s2397_s25 }
 0x802   : > { %v1349_v57 = vpop.xlane.xlu1 %1348 }
 0x803   : > { %2323 = vrcp.f32 %v1349_v57 }
 0x806   : > { %v2295_v32 = vpop.permute.xlu1 %2294 }
 0x807   : > { %v2297_v58 = vunpack.i.h.bf16 %v2295_v32  ;;  %v2296_v37 = vunpack.i.l.bf16 %v2295_v32 }
 0x809   : > { %v2223_v60 = vpack.c.bf16 %v2297_v58, %v2296_v37 }
 0x80d   : > { %v2324_v59 = vpop.eup %2323 }
 0x80e   : > { %v1351_v62 = vmul.f32 %v2324_v59, %v2322_v55 }
 0x810   : > { %2124 = vmatmul.mubr.msk.f32.vlgmr.msra.gmra.mrb[14].mxu1 %vm838_vm4, %v1351_v62 }
 0x811   : > { %2225 = vmatpush3.bf16.xpose.msk.msra.mxu1 %vm2691_vm5, %v2223_v60  ;;  %2134 = vmatprep.mubr.msk.f32.mxu1 %vm2394_vm2, %v2395_v8 }
 0x812   : > { %2226 = vmatprep.subr.bf16.mxu1 %v2393_v3 }
 0x819   : > { %2229 = vmatpush3.bf16.xpose.msk.msra.mxu1 %vm2691_vm5, %v2227_v4 }
 0x81a   : > { %2137 = vmatprep.subr.mxu1 %v2395_v8 }
 0x8e3   : > { %v1424_v6 = vpop.f32.mrb[14].mxu1 }
 0x8e4   : > { %v2125_v7 = vpop.f32.mrb[15].mxu1  ;;  %2135 = vmatmul.mubr.msk.f32.vlgmr.msra.gmra.mrb[16].mxu1 %vm761_vm3, %v1424_v6 }
 0x8e5   : > { %2138 = vmatpush3.xpose.msk.msra.mxu1 %vm761_vm3, %v1521_v5  ;;  %2139 = vmatprep.mubr.msk.f32.mxu1 %vm2394_vm2, %v2395_v8 }
 0x8e6   : > { %2142 = vmatprep.subr.mxu1 %v2395_v8 }
 0x8e8   : > { %2140 = vmatmul.mubr.msk.f32.vlgmr.msra.gmra.mrb[18].mxu1 %vm761_vm3, %v1519_v9 }
 0x8e9   : > { %2144 = vmatprep.mubr.msk.f32.mxu1 %vm2394_vm2, %v2395_v8 }
 0x9b7   : > { %v1513_v10 = vpop.f32.mrb[16].mxu1 }
 0x9b8   : > { %v1517_v11 = vadd.f32 %v1513_v10, %v1260_v46  ;;  %v2136_v12 = vpop.f32.mrb[17].mxu1 }
 0x9bb   : > { %v1592_v13 = vpop.f32.mrb[18].mxu1 }
 0x9bc   : > { %v2141_v14 = vpop.f32.mrb[19].mxu1  ;;  %v1596_v15 = vsel %vm838_vm4, %v1592_v13, -inf }
 0x9bd   : > { %1597 = vmax.xlane.f32.xlu0 %v1596_v15 }
 0x9d3   : > { %1607 = vrot.lane.b32.xlu0 %v2679_v61, %s2398_s15 }
 0x9d7   : > { %2309 = vrot.lane.b32.xlu0 %v2725_v19, %s2398_s15 }
 0xa4a   : > { %v1598_v16 = vpop.xlane.xlu0 %1597 }
 0xa4b   : > { %v1599_v17 = vsub.f32 %v1592_v13, %v1598_v16 }
 0xa4d   : > { %v1600_v20 = vmul.f32 1.442695, %v1599_v17 }
 0xa4e   : > { %v1608_v21 = vpop.permute.xlu0 %1607 }
 0xa4f   : > { %2325 = vpow2.f32 %v1600_v20  ;;  %2143 = vmatpush3.msra.mxu1 %v1608_v21 }
 0xa52   : > { %v2310_v26 = vpop.permute.xlu0 %2309 }
 0xa53   : > { %v2312_v28 = vunpack.i.h.bf16 %v2310_v26  ;;  %v2311_v29 = vunpack.i.l.bf16 %v2310_v26 }
 0xa55   : > { %v2235_v31 = vpack.c.bf16 %v2312_v28, %v2311_v29 }
 0xa59   : > { %v2326_v22 = vpop.eup %2325 }
 0xa5a   : > { %v1602_v8 = vsel %vm838_vm4, %v2326_v22, 0.0 }
 0xa5b   : > { %1603 = vadd.xlane.f32.xlu1 %v1602_v8 }
 0xa6c   : > { %2304 = vrot.lane.b32.xlu1 %v2721_v18, %s2398_s15  ;;  %s2805_s15 = scalar_lea.hbm %s2859_s11, %s1951_s16 }
 0xae8   : > { %v1604_v23 = vpop.xlane.xlu1 %1603 }
 0xae9   : > { %2327 = vrcp.f32 %v1604_v23 }
 0xaec   : > { %v2305_v24 = vpop.permute.xlu1 %2304 }
 0xaed   : > { %v2307_v61 = vunpack.i.h.bf16 %v2305_v24  ;;  %v2306_v25 = vunpack.i.l.bf16 %v2305_v24 }
 0xaef   : > { %v2231_v27 = vpack.c.bf16 %v2307_v61, %v2306_v25 }
 0xaf1   : > { %2233 = vmatpush3.bf16.xpose.msk.msra.mxu0 %vm2691_vm5, %v2231_v27 }
 0xaf2   : > { %2234 = vmatprep.subr.bf16.mxu0 %v2393_v3  ;;  %v1949_v3 = vld [vmem:[%s2858_s10] ss:$0 sm:$0xff] }
 0xaf3   : > { %v2328_v18 = vpop.eup %2327 }
 0xaf4   : > { %v1606_v30 = vmul.f32 %v2328_v18, %v2326_v22 }
 0xaf6   : > { %2145 = vmatmul.mubr.msk.f32.vlgmr.msra.gmra.mrb[20].mxu1 %vm838_vm4, %v1606_v30 }
 0xaf9   : > { %2237 = vmatpush3.bf16.xpose.msk.msra.mxu0 %vm2691_vm5, %v2235_v31 }
 0xbc9   : > { %v1679_v19 = vpop.f32.mrb[20].mxu1 }
 0xbca   : > { %v2146_v33 = vpop.f32.mrb[21].mxu1  ;;  %2156 = vmatmul.mubr.msk.f32.vlgmr.msra.gmra.mrb[6].mxu0 %vm761_vm3, %v1679_v19 }
 0xc9d   : > { %v1768_v34 = vpop.f32.mrb[6].mxu0 }
 0xc9e   : > { %v1772_v35 = vadd.f32 %v1768_v34, %v1517_v11  ;;  %v2157_v36 = vpop.f32.mrb[7].mxu0 }
 0xca0   : > { %v1780_v38 = vadd.f32 %v1949_v3, %v1772_v35 }
 0xca2   : > { %1781 = vst.msk [vmem:[%s403_s22] sm:$0xff] %vm434_vm0, %v1780_v38 }
 0xca3   : > { %2342 = shalt.err (!%p2339_p3)
}
 0xca4   : > { %s2343_s29 = scalar_lea.hbm %s2805_s15, 128  ;;  %s2347_s13 = scalar_lea.hbm %s2859_s11, 256 }
 0xca5   : > { %p2344_p4 = scmp.ne.s32.totalorder %s2805_s15, %s2343_s29  ;;  %p2348_p9 = scmp.lt.u32.totalorder %s2805_s15, %s2859_s11 }
 0xca6   : > { %p2349_p10 = scmp.lt.u32.totalorder %s2347_s13, %s2343_s29  ;;  %p2351_p12 = scmp.lt.u32.totalorder %s2343_s29, %s2805_s15 }
 0xca7   : > { %p2345_p7 = pnand %p2344_p4, %p2498_p5 }
 0xca8   : > { %p2350_p11 = por %p2349_p10, %p2348_p9 }
 0xca9   : > { %p2346_p8 = pneg %p2345_p7 }
 0xcaa   : > { %p2352_p13 = por %p2351_p12, %p2350_p11 }
 0xcac   : > { %p2353_p0 = pnand %p2352_p13, %p2346_p8 }
 0xcae   : > { %2356 = shalt.err (!%p2353_p0)
}
 0xcaf   : > { %2238 = dma.vmem_to_hbm [thread:$0]  (%p2498_p5), %s2807_s24, 128, %s2805_s15, %s1783_s12  }
 0xcb0 PF: > { %p2244_p1 = scmp.ge.s32.totalorder %s2391_s20, 2  ;;  %s1808_s0 = sand.u32 1, %s2379_s17  }
 0xcb1   : > { %s1809_s14 = scalar_lea.sflag [#allocation3], %s1808_s0 }
 0xcb2   : > { %p2241_p2 = pnand %p2244_p1, %p2502_p6 }
 0xcb4   : > { %2374 = dma.done.wait (!%p2241_p2), %s1809_s14, 128  }
 0xcb5   : > { %2376 = vsyncadd (!%p2241_p2), %s1809_s14, 4294967168  ;;  %p21_p3 = scmp.ge.s32.totalorder %s2485_s23, 4   ;;  %s2868_s17 = smov %s2383_s18 }
 0xcb6   : > { %s2869_s18 = smov %s2387_s19  ;;  %s2870_s19 = smov %s2496_s26 }
 0xcb7   : > { %s2871_s20 = smov %s2485_s23  ;;  %23 = sbr.rel (!%p21_p3) target bundleno = 5 (0x5), region = 105 }
 0xcbe   :  { %1814 = vsyncpa [#allocation3], 1 }
 0xcbf   :  { %1816 = vsyncpa [#allocation3 + $0x1], 1 }

</bundles_post_ra>
